<compile_context>
chip_gen: v7x
topology: tpu7x:2x2x1
jax: 0.10.0
libtpu: 0.0.40
codegen_flags: <defaults>
</compile_context>

<pallas_src>
from functools import partial

import numpy as np
import jax
import jax.numpy as jnp
from jax.experimental import pallas as pl
from jax.experimental.pallas import tpu as pltpu

K_HOPS = 3     # TAGConv K (number of propagation hops, K+1 linear maps)
K_SORT = 12    # sort-pool k (module hard-codes self.k = 12)


# ----------------------------- Pallas kernel --------------------------------

def _tag_layer_t(at_bf16, xt_bf16, wt_ref, bt_ref):
    """Transposed-layout TAGConv layer: relu( sum_p W_p^T (A^p x)^T + b^T ).

    Everything stays in [channels, packed_nodes] layout so the lane (last)
    dimension is the packed-node axis (>=256 lanes): lane-dense matmuls,
    accumulator and stores; no concat/transpose/reshape inside the kernel.
    (A^p x)^T = x^T (A^T)^p, so the kernel is fed A_hat^T super-blocks.
    bf16 MXU inputs, f32 accumulation.
    """
    acc = jnp.dot(wt_ref[0], xt_bf16, preferred_element_type=jnp.float32)
    xp = xt_bf16
    for p in range(1, K_HOPS + 1):
        xp = jnp.dot(xp, at_bf16,
                     preferred_element_type=jnp.float32).astype(jnp.bfloat16)
        acc = acc + jnp.dot(wt_ref[p], xp, preferred_element_type=jnp.float32)
    return jnp.maximum(acc + bt_ref[...], 0.0)              # f32 [H, PN]


def tag2_kernel(at_ref, xt_ref, w1t_ref, b1t_ref, w2t_ref, b2t_ref, o_ref):
    """Fused TAGConv(K=3)+ReLU x2 for ONE super-block of packed graphs."""
    at = at_ref[...]                                        # [PN, PN] bf16
    h1t = _tag_layer_t(at, xt_ref[...], w1t_ref, b1t_ref)   # [H, PN] f32
    h2t = _tag_layer_t(at, h1t.astype(jnp.bfloat16), w2t_ref, b2t_ref)
    o_ref[...] = h2t.astype(jnp.bfloat16)                   # lane-dense store


def tag2_forward(at_super, xt_super, w1t, b1t, w2t, b2t):
    """Grid over super-blocks (block-diagonal A_hat^T of `pack` graphs each).

    NOTE(tiling): each super-block ([PN, PN] bf16 A + tiny activations) is far
    below VMEM limits on all generations at these sizes.  If PN grows, budget
    the double-buffered blocks against pltpu.get_tpu_info().vmem_capacity_bytes
    (v7x: 64 MiB physical / ~32 MiB scoped, i.e. HALF of v6e) and add row-block
    tiling of A (reduction axis 'arbitrary') instead of raising vmem_limit_bytes.
    """
    gs, pn, _ = at_super.shape
    f = xt_super.shape[1]
    hidden = w2t.shape[1]
    return pl.pallas_call(
        tag2_kernel,
        out_shape=jax.ShapeDtypeStruct((gs, hidden, pn), jnp.bfloat16),
        grid_spec=pltpu.PrefetchScalarGridSpec(
            num_scalar_prefetch=0,
            grid=(gs,),
            in_specs=[
                pl.BlockSpec((None, pn, pn), lambda i: (i, 0, 0)),   # A_hat^T
                pl.BlockSpec((None, f, pn), lambda i: (i, 0, 0)),    # x^T
                pl.BlockSpec(w1t.shape, lambda i: (0, 0, 0)),        # W1^T per hop
                pl.BlockSpec(b1t.shape, lambda i: (0, 0)),
                pl.BlockSpec(w2t.shape, lambda i: (0, 0, 0)),        # W2^T per hop
                pl.BlockSpec(b2t.shape, lambda i: (0, 0)),
            ],
            out_specs=pl.BlockSpec((None, hidden, pn), lambda i: (i, 0, 0)),
        ),
        compiler_params=pltpu.CompilerParams(
            dimension_semantics=("parallel",),   # super-blocks across TCs (v7x)
        ),
    )(at_super, xt_super, w1t, b1t, w2t, b2t)


# ------------------------------- JAX glue ------------------------------------

def choose_pack(num_graphs, n_per_graph):
    """Graphs packed per super-block: target MXU-native packed tiles (256 for
    v6e/v7x, 128 for v5e) while keeping the grid length >= 2 (megacore) and a
    divisor of the graph count.  Falls back to per-graph blocks for large n."""
    if n_per_graph >= 128:
        return 1
    for target in (256, 128):
        p = max(1, target // n_per_graph)
        while p > 1 and (num_graphs % p != 0 or num_graphs // p < 2):
            p //= 2
        if p > 1:
            return p
    return 1


def global_sort_pool(h, k):
    """PyG global_sort_pool for equal-size contiguous graphs, h: [G, n, d]."""
    # TODO(synk): data-dependent per-graph sort/top-k has no clean Pallas TPU
    # equivalent at this scale; done in plain JAX (the matmul hot path is Pallas).
    g, n, d = h.shape
    order = jnp.argsort(-h[:, :, -1], axis=-1)            # descending, stable
    sorted_x = jnp.take_along_axis(h, order[:, :, None], axis=1)
    if n >= k:
        out = sorted_x[:, :k]
    else:
        fill = h.min() - 1.0
        pad = jnp.full((g, k - n, d), fill, dtype=h.dtype)
        out = jnp.concatenate([sorted_x, pad], axis=1)
        out = jnp.where(out == fill, jnp.zeros_like(out), out)
    return out.reshape(g, k * d)


def build_block_adjacency(edge_index, edge_weight, num_graphs, n_per_graph):
    """Per-graph GCN-normalized adjacency stored as [G, n, n] (never dense
    [G*n, G*n]).  out_i = sum_{(j->i)} d_j^-1/2 * w_ij * d_i^-1/2 * x_j."""
    row, col = edge_index[0], edge_index[1]               # row = src, col = dst
    n_total = num_graphs * n_per_graph
    w = edge_weight
    deg = jnp.zeros((n_total,), jnp.float32).at[col].add(w)
    dinv = jnp.where(deg > 0, jax.lax.rsqrt(deg), 0.0)
    norm = dinv[row] * w * dinv[col]
    g_id = col // n_per_graph
    lr = col % n_per_graph                                # target row in block
    lc = row % n_per_graph                                # source column in block
    return jnp.zeros((num_graphs, n_per_graph, n_per_graph),
                     jnp.float32).at[g_id, lr, lc].add(norm)


def pack_super_blocks_t(a_blocks, pack):
    """[G, n, n] per-graph A_hat -> [G//pack, pack*n, pack*n] block-diagonal
    super-blocks of A_hat^T (transposed so the kernel runs in the lane-dense
    x^T layout).  Pure setup-time layout plumbing (done once)."""
    g, n, _ = a_blocks.shape
    gs, pn = g // pack, pack * n
    at = jnp.transpose(a_blocks, (0, 2, 1)).reshape(gs, pack, n, n)
    a_super_t = jnp.zeros((gs, pn, pn), a_blocks.dtype)
    for q in range(pack):
        a_super_t = a_super_t.at[:, q * n:(q + 1) * n, q * n:(q + 1) * n].set(at[:, q])
    return a_super_t


@partial(jax.jit, static_argnames=("n_per_graph",))
def tag_sort_pool_forward(at_super, xt_super, w1t, b1t, w2t, b2t,
                          wc_flat, bc, wf_t, bf, *, n_per_graph):
    ht = tag2_forward(at_super, xt_super, w1t, b1t, w2t, b2t)   # [Gs, H, PN] bf16
    gs, hidden, pn = ht.shape
    # Wrapper-side layout plumbing back to per-graph [G, n, H] (outside kernel).
    h = ht.transpose(0, 2, 1).astype(jnp.float32)
    h = h.reshape(gs * (pn // n_per_graph), n_per_graph, hidden)
    pooled = global_sort_pool(h, K_SORT)                        # [G, k*H]
    # Conv1d(kernel==length) + ReLU + Linear head: tiny, stays in XLA at
    # default MXU precision (perf review: drop Precision.HIGHEST).
    z = jnp.maximum(jnp.dot(pooled, wc_flat) + bc, 0.0)
    out = jnp.dot(z, wf_t) + bf
    return out, h, pooled


# ------------------------------- references ----------------------------------

def reference_tag2(a64, x64, w1_64, b1, w2_64, b2):
    """f64 per-graph TAGConv x2 with the ORIGINAL per-hop weight layout
    (independent check of the packed / transposed-layout equivalence)."""
    def layer(a_g, x_g, ws, b):
        acc = x_g @ ws[0]
        xp = x_g
        for p in range(1, K_HOPS + 1):
            xp = a_g @ xp
            acc = acc + xp @ ws[p]
        return np.maximum(acc + np.asarray(b, np.float64), 0.0)

    outs = []
    for g in range(a64.shape[0]):
        h = layer(a64[g], x64[g], w1_64, b1)
        h = layer(a64[g], h, w2_64, b2)
        outs.append(h)
    return np.stack(outs)


def reference_head(pooled, conv1d_w, conv1d_b, fc_w, fc_b):
    """f64 Conv1d(NCW, kernel==length) + ReLU + Linear from the pooled features
    (independent check of the pre-permuted-weight head)."""
    p = np.asarray(pooled, np.float64)
    bsz = p.shape[0]
    c = conv1d_w.shape[0]
    xh = p.reshape(bsz, K_SORT, c).transpose(0, 2, 1)           # [B, C, k]
    wc = np.asarray(conv1d_w, np.float64)                       # [C_out, C_in, k]
    h = np.einsum("bck,ock->bo", xh, wc) + np.asarray(conv1d_b, np.float64)
    h = np.maximum(h, 0.0)
    return h @ np.asarray(fc_w, np.float64).T + np.asarray(fc_b, np.float64)


# --------------------------------- main ---------------------------------------

if __name__ == "__main__":
    # Synthetic batch: 32 fully-connected graphs of 16 nodes each (small, but
    # enough graphs that packing gives two [256, 256] super-blocks -> grid=2).
    num_graphs = 32
    n_per_graph = 16                      # == `channels` in the module's __init__
    num_features = 8
    hidden = 4
    out_dim = 2

    # edge_index for fully-connected graphs without self loops.
    s1 = [i for i in range(n_per_graph) for j in range(n_per_graph) if i != j]
    d1 = [j for i in range(n_per_graph) for j in range(n_per_graph) if i != j]
    src = np.concatenate([np.asarray(s1) + g * n_per_graph for g in range(num_graphs)])
    dst = np.concatenate([np.asarray(d1) + g * n_per_graph for g in range(num_graphs)])
    edge_index = jnp.asarray(np.stack([src, dst]), dtype=jnp.int32)

    # Deterministic parameter init (module semantics: edge_weight filled with 1).
    key = jax.random.PRNGKey(0)
    ks = jax.random.split(key, 9)
    x = jax.random.normal(ks[0], (num_graphs * n_per_graph, num_features), jnp.float32)
    w1 = jax.random.normal(ks[1], (K_HOPS + 1, num_features, hidden), jnp.float32) * 0.3
    b1 = jax.random.normal(ks[2], (1, hidden), jnp.float32) * 0.1
    w2 = jax.random.normal(ks[3], (K_HOPS + 1, hidden, hidden), jnp.float32) * 0.3
    b2 = jax.random.normal(ks[4], (1, hidden), jnp.float32) * 0.1
    conv1d_w = jax.random.normal(ks[5], (hidden, hidden, K_SORT), jnp.float32) * 0.1
    conv1d_b = jax.random.normal(ks[6], (hidden,), jnp.float32) * 0.1
    fc_w = jax.random.normal(ks[7], (out_dim, hidden), jnp.float32) * 0.3
    fc_b = jax.random.normal(ks[8], (out_dim,), jnp.float32) * 0.1
    edge_weight_param = jnp.ones((n_per_graph * n_per_graph - n_per_graph, 1), jnp.float32)

    # Replicate the module's edge_weight tiling loop.
    ew = edge_weight_param
    reps = edge_index.shape[-1] // edge_weight_param.shape[0]
    for _ in range(reps - 1):
        ew = jnp.concatenate([ew, edge_weight_param], axis=0)
    edge_weight = ew[:, 0]

    # Per-graph normalized adjacency (also used for the f64 reference).
    a_blocks = build_block_adjacency(edge_index, edge_weight, num_graphs, n_per_graph)

    # --- setup-time layout plumbing (done once) ---
    pack = choose_pack(num_graphs, n_per_graph)        # 16 graphs -> [256,256] tile
    assert num_graphs % pack == 0
    at_super = pack_super_blocks_t(a_blocks, pack).astype(jnp.bfloat16)
    xt_super = (x.reshape(num_graphs // pack, pack * n_per_graph, num_features)
                 .transpose(0, 2, 1).astype(jnp.bfloat16))       # [Gs, F, PN]
    w1t = jnp.transpose(w1, (0, 2, 1)).astype(jnp.bfloat16)      # [K+1, H, F]
    b1t = b1.T                                                   # [H, 1] f32
    w2t = jnp.transpose(w2, (0, 2, 1)).astype(jnp.bfloat16)      # [K+1, H, H]
    b2t = b2.T
    # Conv1d(kernel==length) expressed on the pooled row-major [B, k*C] layout:
    # pooled[b, t*C + c] pairs with conv1d_w[oc, c, t]  ->  pre-permute once.
    wc_flat = jnp.transpose(conv1d_w, (2, 1, 0)).reshape(K_SORT * hidden, hidden)
    bc = conv1d_b.reshape(1, hidden)
    wf_t = fc_w.T
    bf = fc_b.reshape(1, out_dim)

    # --- forward pass ---
    out, h, pooled = tag_sort_pool_forward(
        at_super, xt_super, w1t, b1t, w2t, b2t, wc_flat, bc, wf_t, bf,
        n_per_graph=n_per_graph)
    out = jax.block_until_ready(out)
    assert out.shape == (num_graphs, out_dim)

    # --- numerical checks ---
    # Stage 1: Pallas TAGConv stack vs f64 reference on the bf16-rounded inputs
    # (tolerance covers bf16 intermediates + the bf16 h writeback).
    a64 = np.asarray(a_blocks.astype(jnp.bfloat16).astype(jnp.float32), np.float64)
    x64 = np.asarray(x.astype(jnp.bfloat16).astype(jnp.float32),
                     np.float64).reshape(num_graphs, n_per_graph, num_features)
    w1_64 = np.asarray(w1.astype(jnp.bfloat16).astype(jnp.float32), np.float64)
    w2_64 = np.asarray(w2.astype(jnp.bfloat16).astype(jnp.float32), np.float64)
    h_ref = reference_tag2(a64, x64, w1_64, b1, w2_64, b2)
    assert np.allclose(np.asarray(h), h_ref, atol=5e-2, rtol=5e-2), (
        np.max(np.abs(np.asarray(h) - h_ref)))

    # Stage 2: head (pre-permuted Conv1d-as-matmul + Linear) vs f64 reference
    # computed from the same pooled features.  The head now runs at default
    # MXU precision (per review), so the tolerance is bf16-level.  The pool
    # itself is compared indirectly (sort-tie sensitivity, see review).
    out_ref = reference_head(pooled, conv1d_w, conv1d_b, fc_w, fc_b)
    assert np.allclose(np.asarray(out), out_ref, atol=5e-2, rtol=5e-2), (
        np.max(np.abs(np.asarray(out) - out_ref)))

    print("KERNEL_OK")
</pallas_src>

<mosaic_0001>
module attributes {stable_mosaic.version = 11 : i64} {
  func.func @tag2_kernel(%arg0: i32, %arg1: memref<1x256x256xbf16, #tpu.memory_space<vmem>>, %arg2: memref<1x8x256xbf16, #tpu.memory_space<vmem>>, %arg3: memref<4x4x8xbf16, #tpu.memory_space<vmem>>, %arg4: memref<4x1xf32, #tpu.memory_space<vmem>>, %arg5: memref<4x4x4xbf16, #tpu.memory_space<vmem>>, %arg6: memref<4x1xf32, #tpu.memory_space<vmem>>, %arg7: memref<1x4x256xbf16, #tpu.memory_space<vmem>>) attributes {dimension_semantics = [#tpu.dimension_semantics<parallel>], iteration_bounds = array<i64: 2>, scalar_prefetch = 0 : i64, scratch_operands = 0 : i64, tpu.core_type = #tpu.core_type<tc>, window_params = [{transform_indices = @transform_0, window_bounds = array<i64: 1, 256, 256>}, {transform_indices = @transform_1, window_bounds = array<i64: 1, 8, 256>}, {pipeline_mode = #tpu.pipeline_mode<synchronous>, transform_indices = @transform_2, window_bounds = array<i64: 4, 4, 8>}, {pipeline_mode = #tpu.pipeline_mode<synchronous>, transform_indices = @transform_3, window_bounds = array<i64: 4, 1>}, {pipeline_mode = #tpu.pipeline_mode<synchronous>, transform_indices = @transform_4, window_bounds = array<i64: 4, 4, 4>}, {pipeline_mode = #tpu.pipeline_mode<synchronous>, transform_indices = @transform_5, window_bounds = array<i64: 4, 1>}, {transform_indices = @transform_6, window_bounds = array<i64: 1, 4, 256>}]} {
    %c0 = arith.constant 0 : index
    %c0_0 = arith.constant 0 : index
    %c0_1 = arith.constant 0 : index
    %0 = vector.load %arg1[%c0, %c0_0, %c0_1] : memref<1x256x256xbf16, #tpu.memory_space<vmem>>, vector<1x256x256xbf16>
    %1 = vector.shape_cast %0 : vector<1x256x256xbf16> to vector<256x256xbf16>
    %c0_2 = arith.constant 0 : index
    %c0_3 = arith.constant 0 : index
    %c0_4 = arith.constant 0 : index
    %2 = vector.load %arg2[%c0_2, %c0_3, %c0_4] : memref<1x8x256xbf16, #tpu.memory_space<vmem>>, vector<1x8x256xbf16>
    %3 = vector.shape_cast %2 : vector<1x8x256xbf16> to vector<8x256xbf16>
    %c0_5 = arith.constant 0 : index
    %c0_6 = arith.constant 0 : index
    %c0_7 = arith.constant 0 : index
    %4 = vector.load %arg3[%c0_5, %c0_6, %c0_7] : memref<4x4x8xbf16, #tpu.memory_space<vmem>>, vector<1x4x8xbf16>
    %5 = vector.shape_cast %4 : vector<1x4x8xbf16> to vector<4x8xbf16>
    %cst = arith.constant dense<0.000000e+00> : vector<4x256xf32>
    %6 = tpu.matmul %5, %3, %cst {dimension_numbers = #tpu.dot_dimension_numbers<[1], [0], [0], [1], [0, 0, 1, 1], [], []>} : vector<4x8xbf16>, vector<8x256xbf16>, vector<4x256xf32> -> vector<4x256xf32>
    %cst_8 = arith.constant dense<0.000000e+00> : vector<8x256xf32>
    %7 = tpu.matmul %3, %1, %cst_8 {dimension_numbers = #tpu.dot_dimension_numbers<[1], [0], [0], [1], [0, 0, 1, 1], [], []>} : vector<8x256xbf16>, vector<256x256xbf16>, vector<8x256xf32> -> vector<8x256xf32>
    %8 = arith.truncf %7 : vector<8x256xf32> to vector<8x256xbf16>
    %c1 = arith.constant 1 : index
    %c0_9 = arith.constant 0 : index
    %c0_10 = arith.constant 0 : index
    %9 = vector.load %arg3[%c1, %c0_9, %c0_10] : memref<4x4x8xbf16, #tpu.memory_space<vmem>>, vector<1x4x8xbf16>
    %10 = vector.shape_cast %9 : vector<1x4x8xbf16> to vector<4x8xbf16>
    %cst_11 = arith.constant dense<0.000000e+00> : vector<4x256xf32>
    %11 = tpu.matmul %10, %8, %cst_11 {dimension_numbers = #tpu.dot_dimension_numbers<[1], [0], [0], [1], [0, 0, 1, 1], [], []>} : vector<4x8xbf16>, vector<8x256xbf16>, vector<4x256xf32> -> vector<4x256xf32>
    %12 = arith.addf %6, %11 : vector<4x256xf32>
    %cst_12 = arith.constant dense<0.000000e+00> : vector<8x256xf32>
    %13 = tpu.matmul %8, %1, %cst_12 {dimension_numbers = #tpu.dot_dimension_numbers<[1], [0], [0], [1], [0, 0, 1, 1], [], []>} : vector<8x256xbf16>, vector<256x256xbf16>, vector<8x256xf32> -> vector<8x256xf32>
    %14 = arith.truncf %13 : vector<8x256xf32> to vector<8x256xbf16>
    %c2 = arith.constant 2 : index
    %c0_13 = arith.constant 0 : index
    %c0_14 = arith.constant 0 : index
    %15 = vector.load %arg3[%c2, %c0_13, %c0_14] : memref<4x4x8xbf16, #tpu.memory_space<vmem>>, vector<1x4x8xbf16>
    %16 = vector.shape_cast %15 : vector<1x4x8xbf16> to vector<4x8xbf16>
    %cst_15 = arith.constant dense<0.000000e+00> : vector<4x256xf32>
    %17 = tpu.matmul %16, %14, %cst_15 {dimension_numbers = #tpu.dot_dimension_numbers<[1], [0], [0], [1], [0, 0, 1, 1], [], []>} : vector<4x8xbf16>, vector<8x256xbf16>, vector<4x256xf32> -> vector<4x256xf32>
    %18 = arith.addf %12, %17 : vector<4x256xf32>
    %cst_16 = arith.constant dense<0.000000e+00> : vector<8x256xf32>
    %19 = tpu.matmul %14, %1, %cst_16 {dimension_numbers = #tpu.dot_dimension_numbers<[1], [0], [0], [1], [0, 0, 1, 1], [], []>} : vector<8x256xbf16>, vector<256x256xbf16>, vector<8x256xf32> -> vector<8x256xf32>
    %20 = arith.truncf %19 : vector<8x256xf32> to vector<8x256xbf16>
    %c3 = arith.constant 3 : index
    %c0_17 = arith.constant 0 : index
    %c0_18 = arith.constant 0 : index
    %21 = vector.load %arg3[%c3, %c0_17, %c0_18] : memref<4x4x8xbf16, #tpu.memory_space<vmem>>, vector<1x4x8xbf16>
    %22 = vector.shape_cast %21 : vector<1x4x8xbf16> to vector<4x8xbf16>
    %cst_19 = arith.constant dense<0.000000e+00> : vector<4x256xf32>
    %23 = tpu.matmul %22, %20, %cst_19 {dimension_numbers = #tpu.dot_dimension_numbers<[1], [0], [0], [1], [0, 0, 1, 1], [], []>} : vector<4x8xbf16>, vector<8x256xbf16>, vector<4x256xf32> -> vector<4x256xf32>
    %24 = arith.addf %18, %23 : vector<4x256xf32>
    %c0_20 = arith.constant 0 : index
    %c0_21 = arith.constant 0 : index
    %25 = vector.load %arg4[%c0_20, %c0_21] : memref<4x1xf32, #tpu.memory_space<vmem>>, vector<4x1xf32>
    %26 = vector.broadcast %25 : vector<4x1xf32> to vector<4x256xf32>
    %27 = arith.addf %24, %26 : vector<4x256xf32>
    %cst_22 = arith.constant 0.000000e+00 : f32
    %28 = vector.broadcast %cst_22 : f32 to vector<4x256xf32>
    %29 = arith.maximumf %27, %28 : vector<4x256xf32>
    %30 = arith.truncf %29 : vector<4x256xf32> to vector<4x256xbf16>
    %c0_23 = arith.constant 0 : index
    %c0_24 = arith.constant 0 : index
    %c0_25 = arith.constant 0 : index
    %31 = vector.load %arg5[%c0_23, %c0_24, %c0_25] : memref<4x4x4xbf16, #tpu.memory_space<vmem>>, vector<1x4x4xbf16>
    %32 = vector.shape_cast %31 : vector<1x4x4xbf16> to vector<4x4xbf16>
    %cst_26 = arith.constant dense<0.000000e+00> : vector<4x256xf32>
    %33 = tpu.matmul %32, %30, %cst_26 {dimension_numbers = #tpu.dot_dimension_numbers<[1], [0], [0], [1], [0, 0, 1, 1], [], []>} : vector<4x4xbf16>, vector<4x256xbf16>, vector<4x256xf32> -> vector<4x256xf32>
    %cst_27 = arith.constant dense<0.000000e+00> : vector<4x256xf32>
    %34 = tpu.matmul %30, %1, %cst_27 {dimension_numbers = #tpu.dot_dimension_numbers<[1], [0], [0], [1], [0, 0, 1, 1], [], []>} : vector<4x256xbf16>, vector<256x256xbf16>, vector<4x256xf32> -> vector<4x256xf32>
    %35 = arith.truncf %34 : vector<4x256xf32> to vector<4x256xbf16>
    %c1_28 = arith.constant 1 : index
    %c0_29 = arith.constant 0 : index
    %c0_30 = arith.constant 0 : index
    %36 = vector.load %arg5[%c1_28, %c0_29, %c0_30] : memref<4x4x4xbf16, #tpu.memory_space<vmem>>, vector<1x4x4xbf16>
    %37 = vector.shape_cast %36 : vector<1x4x4xbf16> to vector<4x4xbf16>
    %cst_31 = arith.constant dense<0.000000e+00> : vector<4x256xf32>
    %38 = tpu.matmul %37, %35, %cst_31 {dimension_numbers = #tpu.dot_dimension_numbers<[1], [0], [0], [1], [0, 0, 1, 1], [], []>} : vector<4x4xbf16>, vector<4x256xbf16>, vector<4x256xf32> -> vector<4x256xf32>
    %39 = arith.addf %33, %38 : vector<4x256xf32>
    %cst_32 = arith.constant dense<0.000000e+00> : vector<4x256xf32>
    %40 = tpu.matmul %35, %1, %cst_32 {dimension_numbers = #tpu.dot_dimension_numbers<[1], [0], [0], [1], [0, 0, 1, 1], [], []>} : vector<4x256xbf16>, vector<256x256xbf16>, vector<4x256xf32> -> vector<4x256xf32>
    %41 = arith.truncf %40 : vector<4x256xf32> to vector<4x256xbf16>
    %c2_33 = arith.constant 2 : index
    %c0_34 = arith.constant 0 : index
    %c0_35 = arith.constant 0 : index
    %42 = vector.load %arg5[%c2_33, %c0_34, %c0_35] : memref<4x4x4xbf16, #tpu.memory_space<vmem>>, vector<1x4x4xbf16>
    %43 = vector.shape_cast %42 : vector<1x4x4xbf16> to vector<4x4xbf16>
    %cst_36 = arith.constant dense<0.000000e+00> : vector<4x256xf32>
    %44 = tpu.matmul %43, %41, %cst_36 {dimension_numbers = #tpu.dot_dimension_numbers<[1], [0], [0], [1], [0, 0, 1, 1], [], []>} : vector<4x4xbf16>, vector<4x256xbf16>, vector<4x256xf32> -> vector<4x256xf32>
    %45 = arith.addf %39, %44 : vector<4x256xf32>
    %cst_37 = arith.constant dense<0.000000e+00> : vector<4x256xf32>
    %46 = tpu.matmul %41, %1, %cst_37 {dimension_numbers = #tpu.dot_dimension_numbers<[1], [0], [0], [1], [0, 0, 1, 1], [], []>} : vector<4x256xbf16>, vector<256x256xbf16>, vector<4x256xf32> -> vector<4x256xf32>
    %47 = arith.truncf %46 : vector<4x256xf32> to vector<4x256xbf16>
    %c3_38 = arith.constant 3 : index
    %c0_39 = arith.constant 0 : index
    %c0_40 = arith.constant 0 : index
    %48 = vector.load %arg5[%c3_38, %c0_39, %c0_40] : memref<4x4x4xbf16, #tpu.memory_space<vmem>>, vector<1x4x4xbf16>
    %49 = vector.shape_cast %48 : vector<1x4x4xbf16> to vector<4x4xbf16>
    %cst_41 = arith.constant dense<0.000000e+00> : vector<4x256xf32>
    %50 = tpu.matmul %49, %47, %cst_41 {dimension_numbers = #tpu.dot_dimension_numbers<[1], [0], [0], [1], [0, 0, 1, 1], [], []>} : vector<4x4xbf16>, vector<4x256xbf16>, vector<4x256xf32> -> vector<4x256xf32>
    %51 = arith.addf %45, %50 : vector<4x256xf32>
    %c0_42 = arith.constant 0 : index
    %c0_43 = arith.constant 0 : index
    %52 = vector.load %arg6[%c0_42, %c0_43] : memref<4x1xf32, #tpu.memory_space<vmem>>, vector<4x1xf32>
    %53 = vector.broadcast %52 : vector<4x1xf32> to vector<4x256xf32>
    %54 = arith.addf %51, %53 : vector<4x256xf32>
    %cst_44 = arith.constant 0.000000e+00 : f32
    %55 = vector.broadcast %cst_44 : f32 to vector<4x256xf32>
    %56 = arith.maximumf %54, %55 : vector<4x256xf32>
    %57 = arith.truncf %56 : vector<4x256xf32> to vector<4x256xbf16>
    %c0_45 = arith.constant 0 : index
    %c0_46 = arith.constant 0 : index
    %c0_47 = arith.constant 0 : index
    %58 = vector.load %arg7[%c0_45, %c0_46, %c0_47] : memref<1x4x256xbf16, #tpu.memory_space<vmem>>, vector<1x4x256xbf16>
    %59 = vector.shape_cast %58 : vector<1x4x256xbf16> to vector<4x256xbf16>
    %60 = vector.shape_cast %57 : vector<4x256xbf16> to vector<1x4x256xbf16>
    tpu.vector_store %arg7[%c0_45, %c0_46, %c0_47], %60 {strides = array<i32>} : memref<1x4x256xbf16, #tpu.memory_space<vmem>>, vector<1x4x256xbf16>,
    return
  }
  func.func @transform_0(%arg0: i32) -> (i32, i32, i32) {
    %c0_i32 = arith.constant 0 : i32
    %c0_i32_0 = arith.constant 0 : i32
    %c0_i32_1 = arith.constant 0 : i32
    return %arg0, %c0_i32, %c0_i32_0 : i32, i32, i32
  }
  func.func @transform_1(%arg0: i32) -> (i32, i32, i32) {
    %c0_i32 = arith.constant 0 : i32
    %c0_i32_0 = arith.constant 0 : i32
    %c0_i32_1 = arith.constant 0 : i32
    return %arg0, %c0_i32, %c0_i32_0 : i32, i32, i32
  }
  func.func @transform_2(%arg0: i32) -> (i32, i32, i32) {
    %c0_i32 = arith.constant 0 : i32
    %c0_i32_0 = arith.constant 0 : i32
    %c0_i32_1 = arith.constant 0 : i32
    %c0_i32_2 = arith.constant 0 : i32
    return %c0_i32, %c0_i32_0, %c0_i32_1 : i32, i32, i32
  }
  func.func @transform_3(%arg0: i32) -> (i32, i32) {
    %c0_i32 = arith.constant 0 : i32
    %c0_i32_0 = arith.constant 0 : i32
    %c0_i32_1 = arith.constant 0 : i32
    return %c0_i32, %c0_i32_0 : i32, i32
  }
  func.func @transform_4(%arg0: i32) -> (i32, i32, i32) {
    %c0_i32 = arith.constant 0 : i32
    %c0_i32_0 = arith.constant 0 : i32
    %c0_i32_1 = arith.constant 0 : i32
    %c0_i32_2 = arith.constant 0 : i32
    return %c0_i32, %c0_i32_0, %c0_i32_1 : i32, i32, i32
  }
  func.func @transform_5(%arg0: i32) -> (i32, i32) {
    %c0_i32 = arith.constant 0 : i32
    %c0_i32_0 = arith.constant 0 : i32
    %c0_i32_1 = arith.constant 0 : i32
    return %c0_i32, %c0_i32_0 : i32, i32
  }
  func.func @transform_6(%arg0: i32) -> (i32, i32, i32) {
    %c0_i32 = arith.constant 0 : i32
    %c0_i32_0 = arith.constant 0 : i32
    %c0_i32_1 = arith.constant 0 : i32
    return %arg0, %c0_i32, %c0_i32_0 : i32, i32, i32
  }
}

</mosaic_0001>

<bundles_post_ra>
// kernel: tag_sort_pool_forward.1
= control target key start
LH: loop header
LB: loop body
LE: loop exit
PB: predicated region body
PF: predicated region fallthrough
CT: control target
= control target key end

     0   :  { %11 = vsyncpa [#allocation3], 0  ;;  %s2033_s0 = inlined_call_operand.hbm [shape: bf16[2,256,256], index: 0, kind: input, shape index: {}]   ;;  %s2034_s1 = inlined_call_operand.vmem [shape: bf16[2,8,256], index: 1, kind: input, shape index: {}]   ;;  %s2035_s2 = inlined_call_operand.vmem [shape: bf16[4,4,8], index: 2, kind: input, shape index: {}]   ;;  %s2036_s3 = inlined_call_operand.vmem [shape: f32[4,1], index: 3, kind: input, shape index: {}]   ;;  %s2037_s4 = inlined_call_operand.vmem [shape: bf16[4,4,4], index: 4, kind: input, shape index: {}]   ;;  %s2038_s5 = inlined_call_operand.vmem [shape: f32[4,1], index: 5, kind: input, shape index: {}]   ;;  %s2039_s6 = inlined_call_operand.vmem [shape: bf16[2,4,256], index: 6, kind: output, shape index: {}]  }
   0x1   :  { %13 = vsyncpa [#allocation3 + $0x1], 0  ;;  %s1565_s21 = smov 0   ;;  %s1567_s22 = smov 0  }
   0x2   :  { %s1569_s23 = smov 0   ;;  %s1571_s24 = smov 0  }
   0x3 LB: > { %s1584_s25 = sadd.s32 4294967295, %s1524_s24   ;;  %s1587_s26 = sadd.s32 1, %s1524_s24   ;;  %s1524_s24 = sphi %s1571_s24, %s2046_s24   ;;  %s1520_s23 = sphi %s1569_s23, %s2045_s23   ;;  %s1516_s22 = sphi %s1567_s22, %s2044_s22   ;;  %s1512_s21 = sphi %s1565_s21, %s2043_s21  }
   0x4   : > { %s23_s27 = ssub.s32 %s1524_s24, %s1587_s26  ;;  %s26_s28 = sadd.s32 1, %s1520_s23 }
   0x5   : > { %p24_p0 = scmp.eq.s32.totalorder %s23_s27, 0  ;;  %p33_p1 = scmp.ne.s32.totalorder %s1520_s23, %s1516_s22 }
   0x6   : > { %p34_p2 = scmp.eq.s32.totalorder %s1524_s24, 0  ;;  %p39_p3 = scmp.ne.s32.totalorder %s1516_s22, %s1512_s21 }
   0x7   : > { %s1597_s29 = scalar_select %p24_p0, %s1520_s23, %s26_s28  }
   0x8   : > { %p35_p4 = por %p34_p2, %p33_p1  ;;  %p40_p5 = scmp.eq.s32.totalorder %s1584_s25, 0 }
   0x9   : > { %p1373_p6 = scmp.lt.s32.totalorder %s1524_s24, 2  ;;  %s211_s7 = sand.u32 1, %s1520_s23  }
   0xa   : > { %p1601_p7 = por %p40_p5, %p39_p3  ;;  %s1295_s8 = sshll.u32 %s211_s7, 8 }
   0xb   : > { %s1364_s9 = sshll.u32 %s1524_s24, 12  ;;  %s215_s13 = scalar_lea.vmem [#allocation2], %s1295_s8 }
   0xc   : > { %s1610_s12 = scalar_lea.hbm %s2033_s0, %s1364_s9  ;;  %s222_s14 = sshll.u32 %s215_s13, 4  ;;  %s1612_s14 = int_to_ptr.vmem [resolvable:$true] %s222_s14 }
   0xd   : > { %p1614_p8 = pnand %p1373_p6, %p35_p4  ;;  %s1619_s16 = scalar_lea.sflag [#allocation3], %s211_s7 }
   0xe   : > { %s1460_s17 = scalar_lea.hbm %s1610_s12, 4096  ;;  %s1465_s20 = scalar_lea.hbm %s2033_s0, 8192 }
   0xf   : > { %p1461_p10 = scmp.ne.s32.totalorder %s1610_s12, %s1460_s17  ;;  %p1462_p11 = pneg %p1614_p8 }
  0x10   : > { %p1466_p0 = scmp.lt.u32.totalorder %s1610_s12, %s2033_s0  ;;  %p1467_p1 = scmp.lt.u32.totalorder %s1465_s20, %s1460_s17 }
  0x11   : > { %p1463_p12 = pnand %p1462_p11, %p1461_p10  ;;  %p1469_p3 = scmp.lt.u32.totalorder %s1460_s17, %s1610_s12 }
  0x12   : > { %p1468_p2 = por %p1467_p1, %p1466_p0 }
  0x13   : > { %p1464_p13 = pneg %p1463_p12 }
  0x14   : > { %p1470_p4 = por %p1469_p3, %p1468_p2 }
  0x16   : > { %p1471_p5 = pnand %p1470_p4, %p1464_p13 }
  0x18   : > { %1474 = shalt.err (!%p1471_p5)
}
  0x19   : > { %s1475_s28 = scalar_lea.vmem %s1612_s14, 4096  ;;  %s1526_s7 = smov [#allocation2]  }
  0x1a   : > { %p1476_p6 = scmp.ne.s32.totalorder %s1612_s14, %s1475_s28  ;;  %s1480_s8 = sshll.u32 %s1526_s7, 4  ;;  %s1481_s8 = int_to_ptr.vmem [resolvable:$false] %s1480_s8 }
  0x1b   : > { %s1482_s9 = scalar_lea.vmem %s1481_s8, 8192  ;;  %p1483_p9 = scmp.lt.s32.totalorder %s1612_s14, %s1481_s8 }
  0x1c   : > { %p1478_p10 = pnand %p1476_p6, %p1462_p11  ;;  %p1484_p0 = scmp.lt.s32.totalorder %s1482_s9, %s1475_s28 }
  0x1e   : > { %p1479_p12 = pneg %p1478_p10  ;;  %p1485_p1 = por %p1484_p0, %p1483_p9 }
  0x20   : > { %p1486_p2 = pnand %p1485_p1, %p1479_p12 }
  0x22   : > { %1489 = shalt.err (!%p1486_p2)
}
  0x23   : > { %s1527_s10 = smov 128   ;;  %s1528_s11 = smov 8  }
  0x24   : > { %1372 = dma.hbm_to_vmem [thread:$0]  (!%p1614_p8), %s1610_s12, 4096, %s1612_s14, %s1619_s16, %s1527_s10, %s1527_s10, %s1528_s11  }
  0x25   : > { %p238_p11 = scmp.lt.s32.totalorder %s1524_s24, 3  ;;  %p2042_p13 = scmp.ge.s32.totalorder %s1524_s24, 1 }
  0x27   : > { %p239_p3 = pnand %p2042_p13, %p238_p11 }
  0x28   : > { %s244_s13 = sand.u32 (!%p239_p3), 1, %s1516_s22  }
  0x29   : > { %242 = sbr.rel (%p239_p3) target bundleno = 2069 (0x815), region = 44  ;;  %s1299_s17 = sshll.u32 (!%p239_p3), %s244_s13, 8 }
  0x2a   : > { %s245_s18 = scalar_lea.sflag (!%p239_p3), [#allocation3], %s244_s13  ;;  %s1651_s19 = scalar_lea.vmem (!%p239_p3), [#allocation2], %s1299_s17 }
  0x30   : > { %1507 = dma.done.wait (%p1601_p7), %s245_s18, 4096  }
  0x31   : > { %1509 = vsyncadd (%p1601_p7), %s245_s18, 4294963200  ;;  %v1658_v0 = vld [vmem:[%s1651_s19 + $0x4] ss:$8 sps:$4 sm:$0xff]   ;;  %v1661_v1 = vld [vmem:[%s1651_s19] ss:$8 sps:$4 sm:$0xff]   ;;  %p282_p7 = scmp.lt.s32.totalorder %s1584_s25, 1 }
  0x32   : > { %494 = vmatprep.subr.bf16.mxu0 %v1658_v0  ;;  %v1665_v2 = vld [vmem:[%s1651_s19 + $0x14] ss:$8 sps:$4 sm:$0xff]   ;;  %v1669_v3 = vld [vmem:[%s1651_s19 + $0x10] ss:$8 sps:$4 sm:$0xff]   ;;  %v1673_v4 = vld [vmem:[%s1651_s19 + $0x24] ss:$8 sps:$4 sm:$0xff]  }
  0x33   : > { %495 = vmatpush1.bf16.msra.mxu0 %v1661_v1  ;;  %v1677_v5 = vld [vmem:[%s1651_s19 + $0x20] ss:$8 sps:$4 sm:$0xff]   ;;  %v1682_v6 = vld [vmem:[%s1651_s19 + $0x34] ss:$8 sps:$4 sm:$0xff]   ;;  %v1686_v7 = vld [vmem:[%s1651_s19 + $0x30] ss:$8 sps:$4 sm:$0xff]  }
  0x34   : > { %496 = vmatprep.subr.bf16.mxu0 %v1665_v2  ;;  %s2048_s25 = smov (!%p282_p7, %s1584_s25), 1  ;;  %v1693_v8 = vld [vmem:[%s1651_s19 + $0x44] ss:$8 sps:$4 sm:$0xff]   ;;  %v1697_v9 = vld [vmem:[%s1651_s19 + $0x40] ss:$8 sps:$4 sm:$0xff]   ;;  %v1529_v35 = vmov 0  }
  0x35   : > { %s1365_s24 = sshll.u32 %s2048_s25, 3  ;;  %v1702_v10 = vld [vmem:[%s1651_s19 + $0x54] ss:$8 sps:$4 sm:$0xff]   ;;  %v1709_v11 = vld [vmem:[%s1651_s19 + $0x50] ss:$8 sps:$4 sm:$0xff]   ;;  %582 = vmatprep.mubr.bf16.mxu1 %v1529_v35  ;;  %1409 = vset.pattern.permute.xlu0 %v1529_v35  ;;  %vm543_vm0 = vcmask 1043456  }
  0x36   : > { %s286_s14 = scalar_lea.vmem %s2034_s1, %s1365_s24  ;;  %v1713_v12 = vld [vmem:[%s1651_s19 + $0x64] ss:$8 sps:$4 sm:$0xff]   ;;  %v1717_v15 = vld [vmem:[%s1651_s19 + $0x60] ss:$8 sps:$4 sm:$0xff]   ;;  %v1721_v16 = vld [vmem:[%s1651_s19 + $0x74] ss:$8 sps:$4 sm:$0xff]  }
  0x37   : > { %497 = vmatpush1.bf16.msra.mxu0 %v1669_v3  ;;  %v325_v13 = vld [vmem:[%s286_s14] sm:$0xff]  ;;  %v1725_v17 = vld [vmem:[%s1651_s19 + $0x70] ss:$8 sps:$4 sm:$0xff]   ;;  %v1737_v20 = vld [vmem:[%s1651_s19 + $0x94] ss:$8 sps:$4 sm:$0xff]   ;;  %vm539_vm1 = vcmask 64512  }
  0x38   : > { %498 = vmatprep.subr.bf16.mxu0 %v1673_v4  ;;  %v1305_v14 = vcombine.high %v325_v13, %v325_v13  ;;  %v1729_v18 = vld [vmem:[%s1651_s19 + $0x84] ss:$8 sps:$4 sm:$0xff]   ;;  %v1733_v19 = vld [vmem:[%s1651_s19 + $0x80] ss:$8 sps:$4 sm:$0xff]   ;;  %v1741_v21 = vld [vmem:[%s1651_s19 + $0x90] ss:$8 sps:$4 sm:$0xff]   ;;  %v1304_v34 = vcombine.low %v325_v13, %v325_v13 }
  0x39   : > { %v1745_v22 = vld [vmem:[%s1651_s19 + $0xa4] ss:$8 sps:$4 sm:$0xff]   ;;  %v1749_v23 = vld [vmem:[%s1651_s19 + $0xa0] ss:$8 sps:$4 sm:$0xff]   ;;  %v1753_v24 = vld [vmem:[%s1651_s19 + $0xb4] ss:$8 sps:$4 sm:$0xff]  }
  0x3a   : > { %526 = vmatprep.mubr.bf16.mxu0 %v1305_v14  ;;  %v1757_v25 = vld [vmem:[%s1651_s19 + $0xb0] ss:$8 sps:$4 sm:$0xff]   ;;  %v1761_v26 = vld [vmem:[%s1651_s19 + $0xc4] ss:$8 sps:$4 sm:$0xff]   ;;  %v1765_v27 = vld [vmem:[%s1651_s19 + $0xc0] ss:$8 sps:$4 sm:$0xff]  }
  0x3b   : > { %499 = vmatpush1.bf16.msra.mxu0 %v1677_v5  ;;  %v1769_v28 = vld [vmem:[%s1651_s19 + $0xd4] ss:$8 sps:$4 sm:$0xff]   ;;  %v1773_v29 = vld [vmem:[%s1651_s19 + $0xd0] ss:$8 sps:$4 sm:$0xff]   ;;  %v1777_v30 = vld [vmem:[%s1651_s19 + $0xe4] ss:$8 sps:$4 sm:$0xff]  }
  0x3c   : > { %500 = vmatprep.subr.bf16.mxu0 %v1682_v6  ;;  %v1781_v31 = vld [vmem:[%s1651_s19 + $0xe0] ss:$8 sps:$4 sm:$0xff]   ;;  %v1785_v32 = vld [vmem:[%s1651_s19 + $0xf4] ss:$8 sps:$4 sm:$0xff]   ;;  %v1789_v33 = vld [vmem:[%s1651_s19 + $0xf0] ss:$8 sps:$4 sm:$0xff]  }
  0x3d   : > { %v1338_v43 = vld [vmem:[%s2035_s2 + $0x2] sm:$0x3]  ;;  %v595_v44 = vsel %vm543_vm0, %v1304_v34, 0  ;;  %v326_v45 = vld [vmem:[%s2035_s2] sm:$0x3]  ;;  %vm897_vm2 = vcmask 1041408  }
  0x3e   : > { %v1343_v63 = vld [vmem:[%s2035_s2 + $0x4] sm:$0x3]  ;;  %v835_v13 = vld [vmem:[%s2036_s3] sm:$0xf]  ;;  %vm893_vm3 = vcmask 31744   ;;  %s1366_s16 = sshll.u32 %s2048_s25, 2 }
  0x3f   : > { %501 = vmatpush1.bf16.msra.mxu0 %v1686_v7  ;;  %838 = vperm.xlu0 %1409, %v835_v13   ;;  %s291_s27 = scalar_lea.vmem %s2039_s6, %s1366_s16 }
  0x40   : > { %502 = vmatprep.subr.bf16.mxu0 %v1693_v8 }
  0x43   : > { %503 = vmatpush1.bf16.msra.mxu0 %v1697_v9 }
  0x44   : > { %504 = vmatprep.subr.bf16.mxu0 %v1702_v10 }
  0x47   : > { %505 = vmatpush1.bf16.msra.mxu0 %v1709_v11 }
  0x48   : > { %506 = vmatprep.subr.bf16.mxu0 %v1713_v12 }
  0x4b   : > { %507 = vmatpush1.bf16.msra.mxu0 %v1717_v15 }
  0x4c   : > { %508 = vmatprep.subr.bf16.mxu0 %v1721_v16 }
  0x4f   : > { %509 = vmatpush1.bf16.msra.mxu0 %v1725_v17 }
  0x50   : > { %510 = vmatprep.subr.bf16.mxu0 %v1729_v18 }
  0x53   : > { %511 = vmatpush1.bf16.msra.mxu0 %v1733_v19 }
  0x54   : > { %512 = vmatprep.subr.bf16.mxu0 %v1737_v20 }
  0x57   : > { %513 = vmatpush1.bf16.msra.mxu0 %v1741_v21 }
  0x58   : > { %514 = vmatprep.subr.bf16.mxu0 %v1745_v22 }
  0x5b   : > { %515 = vmatpush1.bf16.msra.mxu0 %v1749_v23 }
  0x5c   : > { %516 = vmatprep.subr.bf16.mxu0 %v1753_v24 }
  0x5f   : > { %517 = vmatpush1.bf16.msra.mxu0 %v1757_v25 }
  0x60   : > { %518 = vmatprep.subr.bf16.mxu0 %v1761_v26 }
  0x63   : > { %519 = vmatpush1.bf16.msra.mxu0 %v1765_v27 }
  0x64   : > { %520 = vmatprep.subr.bf16.mxu0 %v1769_v28 }
  0x67   : > { %521 = vmatpush1.bf16.msra.mxu0 %v1773_v29 }
  0x68   : > { %522 = vmatprep.subr.bf16.mxu0 %v1777_v30 }
  0x6b   : > { %523 = vmatpush1.bf16.msra.mxu0 %v1781_v31 }
  0x6c   : > { %524 = vmatprep.subr.bf16.mxu0 %v1785_v32 }
  0x6f   : > { %525 = vmatpush1.bf16.msra.mxu0 %v1789_v33 }
  0x72   : > { %527 = vmatmul.mubr.bf16.vlgmr.msra.gmra.mrb[0].mxu0 %v1304_v34 }
  0x73   : > { %727 = vmatprep.mubr.bf16.mxu0 %v1529_v35 }
 0x145   : > { %v528_v36 = vpop.f32.mrb[0].mxu0 }
 0x146   : > { %v535_v37 = vpack.c.bf16 %v528_v36, %v528_v36  ;;  %v530_v38 = vpop.f32.mrb[1].mxu0 }
 0x147   : > { %v536_v39 = vpack.c.bf16 %v530_v38, %v530_v38  ;;  %v532_v40 = vpop.f32.mrb[2].mxu0 }
 0x148   : > { %v533_v41 = vpop.f32.mrb[3].mxu0  ;;  %v545_v42 = vsel %vm543_vm0, %v535_v37, 0 }
 0x149   : > { %1339 = vmatprep.subr.msk.bf16.mxu1 %vm543_vm0, %v536_v39 }
 0x14a   : > { %551 = vmatpush1.bf16.msra.mxu1 %v545_v42 }
 0x14b   : > { %1341 = vmatprep.subr.msk.bf16.mxu1 %vm543_vm0, %v1305_v14  ;;  %v1189_v14 = vld [vmem:[%s2038_s5] sm:$0xf] }
 0x14c   : > { %1192 = vperm.xlu0 %1409, %v1189_v14  }
 0x14d   : > { %1340 = vmatmul.mubr.msk.bf16.vlgmr.msra.gmra.mrb[0].mxu1 %vm539_vm1, %v1338_v43 }
 0x14e   : > { %601 = vmatpush1.bf16.msra.mxu1 %v595_v44  ;;  %632 = vmatprep.mubr.bf16.mxu1 %v1529_v35 }
 0x14f   : > { %641 = vmatprep.subr.bf16.mxu1 %v1658_v0 }
 0x155   : > { %1342 = vmatmul.mubr.msk.bf16.vlgmr.msra.gmra.mrb[4].mxu1 %vm539_vm1, %v326_v45 }
 0x156   : > { %642 = vmatpush1.bf16.msra.mxu1 %v1661_v1  ;;  %673 = vmatprep.mubr.bf16.mxu1 %v536_v39 }
 0x157   : > { %643 = vmatprep.subr.bf16.mxu1 %v1665_v2 }
 0x15a   : > { %644 = vmatpush1.bf16.msra.mxu1 %v1669_v3 }
 0x15b   : > { %645 = vmatprep.subr.bf16.mxu1 %v1673_v4 }
 0x15e   : > { %646 = vmatpush1.bf16.msra.mxu1 %v1677_v5 }
 0x15f   : > { %647 = vmatprep.subr.bf16.mxu1 %v1682_v6 }
 0x162   : > { %648 = vmatpush1.bf16.msra.mxu1 %v1686_v7 }
 0x163   : > { %649 = vmatprep.subr.bf16.mxu1 %v1693_v8 }
 0x166   : > { %650 = vmatpush1.bf16.msra.mxu1 %v1697_v9 }
 0x167   : > { %651 = vmatprep.subr.bf16.mxu1 %v1702_v10 }
 0x16a   : > { %652 = vmatpush1.bf16.msra.mxu1 %v1709_v11 }
 0x16b   : > { %653 = vmatprep.subr.bf16.mxu1 %v1713_v12 }
 0x16e   : > { %654 = vmatpush1.bf16.msra.mxu1 %v1717_v15 }
 0x16f   : > { %655 = vmatprep.subr.bf16.mxu1 %v1721_v16 }
 0x172   : > { %656 = vmatpush1.bf16.msra.mxu1 %v1725_v17 }
 0x173   : > { %657 = vmatprep.subr.bf16.mxu1 %v1729_v18 }
 0x176   : > { %658 = vmatpush1.bf16.msra.mxu1 %v1733_v19 }
 0x177   : > { %659 = vmatprep.subr.bf16.mxu1 %v1737_v20 }
 0x17a   : > { %660 = vmatpush1.bf16.msra.mxu1 %v1741_v21 }
 0x17b   : > { %661 = vmatprep.subr.bf16.mxu1 %v1745_v22 }
 0x17e   : > { %662 = vmatpush1.bf16.msra.mxu1 %v1749_v23 }
 0x17f   : > { %663 = vmatprep.subr.bf16.mxu1 %v1753_v24 }
 0x182   : > { %664 = vmatpush1.bf16.msra.mxu1 %v1757_v25 }
 0x183   : > { %665 = vmatprep.subr.bf16.mxu1 %v1761_v26 }
 0x186   : > { %666 = vmatpush1.bf16.msra.mxu1 %v1765_v27 }
 0x187   : > { %667 = vmatprep.subr.bf16.mxu1 %v1769_v28 }
 0x18a   : > { %668 = vmatpush1.bf16.msra.mxu1 %v1773_v29 }
 0x18b   : > { %669 = vmatprep.subr.bf16.mxu1 %v1777_v30 }
 0x18e   : > { %670 = vmatpush1.bf16.msra.mxu1 %v1781_v31 }
 0x18f   : > { %671 = vmatprep.subr.bf16.mxu1 %v1785_v32 }
 0x192   : > { %672 = vmatpush1.bf16.msra.mxu1 %v1789_v33 }
 0x195   : > { %674 = vmatmul.mubr.bf16.vlgmr.msra.gmra.mrb[8].mxu1 %v535_v37 }
 0x196   : > { %824 = vmatprep.mubr.bf16.mxu1 %v1529_v35 }
 0x220   : > { %v584_v46 = vpop.f32.mrb[0].mxu1 }
 0x221   : > { %v586_v47 = vpop.f32.mrb[1].mxu1 }
 0x222   : > { %v588_v48 = vpop.f32.mrb[2].mxu1 }
 0x223   : > { %v589_v49 = vpop.f32.mrb[3].mxu1  ;;  %v1346_v48 = vld [vmem:[%s2035_s2 + $0x6] sm:$0x3] }
 0x228   : > { %v634_v50 = vpop.f32.mrb[4].mxu1 }
 0x229   : > { %v635_v51 = vadd.f32 %v634_v50, %v584_v46  ;;  %v636_v52 = vpop.f32.mrb[5].mxu1 }
 0x22a   : > { %v637_v53 = vadd.f32 %v636_v52, %v586_v47  ;;  %v638_v54 = vpop.f32.mrb[6].mxu1  ;;  %v839_v52 = vpop.permute.xlu0 %838 }
 0x22b   : > { %v639_v55 = vpop.f32.mrb[7].mxu1 }
 0x268   : > { %v675_v56 = vpop.f32.mrb[8].mxu1 }
 0x269   : > { %v682_v57 = vpack.c.bf16 %v675_v56, %v675_v56  ;;  %v677_v58 = vpop.f32.mrb[9].mxu1 }
 0x26a   : > { %v683_v59 = vpack.c.bf16 %v677_v58, %v677_v58  ;;  %v679_v60 = vpop.f32.mrb[10].mxu1 }
 0x26b   : > { %v690_v61 = vsel %vm543_vm0, %v682_v57, 0  ;;  %v680_v62 = vpop.f32.mrb[11].mxu1 }
 0x26c   : > { %1344 = vmatprep.subr.msk.bf16.mxu0 %vm543_vm0, %v683_v59 }
 0x26d   : > { %696 = vmatpush1.bf16.msra.mxu0 %v690_v61 }
 0x26e   : > { %738 = vmatprep.subr.bf16.mxu0 %v1658_v0 }
 0x270   : > { %1345 = vmatmul.mubr.msk.bf16.vlgmr.msra.gmra.mrb[4].mxu0 %vm539_vm1, %v1343_v63 }
 0x271   : > { %739 = vmatpush1.bf16.msra.mxu0 %v1661_v1  ;;  %770 = vmatprep.mubr.bf16.mxu0 %v683_v59 }
 0x272   : > { %740 = vmatprep.subr.bf16.mxu0 %v1665_v2 }
 0x275   : > { %741 = vmatpush1.bf16.msra.mxu0 %v1669_v3 }
 0x276   : > { %742 = vmatprep.subr.bf16.mxu0 %v1673_v4 }
 0x279   : > { %743 = vmatpush1.bf16.msra.mxu0 %v1677_v5 }
 0x27a   : > { %744 = vmatprep.subr.bf16.mxu0 %v1682_v6 }
 0x27d   : > { %745 = vmatpush1.bf16.msra.mxu0 %v1686_v7 }
 0x27e   : > { %746 = vmatprep.subr.bf16.mxu0 %v1693_v8 }
 0x281   : > { %747 = vmatpush1.bf16.msra.mxu0 %v1697_v9 }
 0x282   : > { %748 = vmatprep.subr.bf16.mxu0 %v1702_v10 }
 0x285   : > { %749 = vmatpush1.bf16.msra.mxu0 %v1709_v11 }
 0x286   : > { %750 = vmatprep.subr.bf16.mxu0 %v1713_v12 }
 0x289   : > { %751 = vmatpush1.bf16.msra.mxu0 %v1717_v15 }
 0x28a   : > { %752 = vmatprep.subr.bf16.mxu0 %v1721_v16 }
 0x28d   : > { %753 = vmatpush1.bf16.msra.mxu0 %v1725_v17 }
 0x28e   : > { %754 = vmatprep.subr.bf16.mxu0 %v1729_v18 }
 0x291   : > { %755 = vmatpush1.bf16.msra.mxu0 %v1733_v19 }
 0x292   : > { %756 = vmatprep.subr.bf16.mxu0 %v1737_v20 }
 0x295   : > { %757 = vmatpush1.bf16.msra.mxu0 %v1741_v21 }
 0x296   : > { %758 = vmatprep.subr.bf16.mxu0 %v1745_v22 }
 0x299   : > { %759 = vmatpush1.bf16.msra.mxu0 %v1749_v23 }
 0x29a   : > { %760 = vmatprep.subr.bf16.mxu0 %v1753_v24 }
 0x29d   : > { %761 = vmatpush1.bf16.msra.mxu0 %v1757_v25 }
 0x29e   : > { %762 = vmatprep.subr.bf16.mxu0 %v1761_v26 }
 0x2a1   : > { %763 = vmatpush1.bf16.msra.mxu0 %v1765_v27 }
 0x2a2   : > { %764 = vmatprep.subr.bf16.mxu0 %v1769_v28 }
 0x2a5   : > { %765 = vmatpush1.bf16.msra.mxu0 %v1773_v29 }
 0x2a6   : > { %766 = vmatprep.subr.bf16.mxu0 %v1777_v30 }
 0x2a9   : > { %767 = vmatpush1.bf16.msra.mxu0 %v1781_v31 }
 0x2aa   : > { %768 = vmatprep.subr.bf16.mxu0 %v1785_v32 }
 0x2ad   : > { %769 = vmatpush1.bf16.msra.mxu0 %v1789_v33 }
 0x2b0   : > { %771 = vmatmul.mubr.bf16.vlgmr.msra.gmra.mrb[8].mxu0 %v682_v57 }
 0x2b1   : > { %936 = vmatprep.mubr.bf16.mxu0 %v1529_v35 }
 0x343   : > { %v729_v34 = vpop.f32.mrb[4].mxu0 }
 0x344   : > { %v736_v36 = vadd.f32 %v729_v34, %v635_v51  ;;  %v731_v37 = vpop.f32.mrb[5].mxu0 }
 0x345   : > { %v737_v38 = vadd.f32 %v731_v37, %v637_v53  ;;  %v733_v39 = vpop.f32.mrb[6].mxu0 }
 0x346   : > { %v734_v40 = vpop.f32.mrb[7].mxu0 }
 0x347   : > { %v847_v40 = vld [vmem:[%s2037_s4] sm:$0x3] }
 0x383   : > { %v772_v41 = vpop.f32.mrb[8].mxu0 }
 0x384   : > { %v779_v42 = vpack.c.bf16 %v772_v41, %v772_v41  ;;  %v774_v43 = vpop.f32.mrb[9].mxu0 }
 0x385   : > { %v780_v44 = vpack.c.bf16 %v774_v43, %v774_v43  ;;  %v776_v45 = vpop.f32.mrb[10].mxu0 }
 0x386   : > { %v787_v46 = vsel %vm543_vm0, %v779_v42, 0  ;;  %v777_v47 = vpop.f32.mrb[11].mxu0 }
 0x387   : > { %1347 = vmatprep.subr.msk.bf16.mxu1 %vm543_vm0, %v780_v44 }
 0x388   : > { %793 = vmatpush1.bf16.msra.mxu1 %v787_v46 }
 0x389   : > { %848 = vmatprep.subr.bf16.mxu1 %v1658_v0 }
 0x38b   : > { %1348 = vmatmul.mubr.msk.bf16.vlgmr.msra.gmra.mrb[12].mxu1 %vm539_vm1, %v1346_v48 }
 0x38c   : > { %849 = vmatpush1.bf16.msra.mxu1 %v1661_v1 }
 0x38d   : > { %850 = vmatprep.subr.bf16.mxu1 %v1665_v2 }
 0x390   : > { %851 = vmatpush1.bf16.msra.mxu1 %v1669_v3 }
 0x391   : > { %852 = vmatprep.subr.bf16.mxu1 %v1673_v4 }
 0x394   : > { %853 = vmatpush1.bf16.msra.mxu1 %v1677_v5 }
 0x395   : > { %854 = vmatprep.subr.bf16.mxu1 %v1682_v6 }
 0x398   : > { %855 = vmatpush1.bf16.msra.mxu1 %v1686_v7 }
 0x399   : > { %856 = vmatprep.subr.bf16.mxu1 %v1693_v8 }
 0x39c   : > { %857 = vmatpush1.bf16.msra.mxu1 %v1697_v9 }
 0x39d   : > { %858 = vmatprep.subr.bf16.mxu1 %v1702_v10 }
 0x3a0   : > { %859 = vmatpush1.bf16.msra.mxu1 %v1709_v11 }
 0x3a1   : > { %860 = vmatprep.subr.bf16.mxu1 %v1713_v12 }
 0x3a4   : > { %861 = vmatpush1.bf16.msra.mxu1 %v1717_v15 }
 0x3a5   : > { %862 = vmatprep.subr.bf16.mxu1 %v1721_v16 }
 0x3a8   : > { %863 = vmatpush1.bf16.msra.mxu1 %v1725_v17 }
 0x3a9   : > { %864 = vmatprep.subr.bf16.mxu1 %v1729_v18 }
 0x3ac   : > { %865 = vmatpush1.bf16.msra.mxu1 %v1733_v19 }
 0x3ad   : > { %866 = vmatprep.subr.bf16.mxu1 %v1737_v20 }
 0x3b0   : > { %867 = vmatpush1.bf16.msra.mxu1 %v1741_v21 }
 0x3b1   : > { %868 = vmatprep.subr.bf16.mxu1 %v1745_v22 }
 0x3b4   : > { %869 = vmatpush1.bf16.msra.mxu1 %v1749_v23 }
 0x3b5   : > { %870 = vmatprep.subr.bf16.mxu1 %v1753_v24 }
 0x3b8   : > { %871 = vmatpush1.bf16.msra.mxu1 %v1757_v25 }
 0x3b9   : > { %872 = vmatprep.subr.bf16.mxu1 %v1761_v26 }
 0x3bc   : > { %873 = vmatpush1.bf16.msra.mxu1 %v1765_v27 }
 0x3bd   : > { %874 = vmatprep.subr.bf16.mxu1 %v1769_v28 }
 0x3c0   : > { %875 = vmatpush1.bf16.msra.mxu1 %v1773_v29 }
 0x3c1   : > { %876 = vmatprep.subr.bf16.mxu1 %v1777_v30 }
 0x3c4   : > { %877 = vmatpush1.bf16.msra.mxu1 %v1781_v31 }
 0x3c5   : > { %878 = vmatprep.subr.bf16.mxu1 %v1785_v32 }
 0x3c8   : > { %879 = vmatpush1.bf16.msra.mxu1 %v1789_v33 }
 0x3c9   : > { %995 = vmatprep.subr.bf16.mxu1 %v1658_v0 }
 0x45e   : > { %v826_v49 = vpop.f32.mrb[12].mxu1 }
 0x45f   : > { %v833_v50 = vadd.f32 %v826_v49, %v736_v36  ;;  %v828_v51 = vpop.f32.mrb[13].mxu1 }
 0x460   : > { %v834_v53 = vadd.f32 %v828_v51, %v737_v38  ;;  %v830_v54 = vpop.f32.mrb[14].mxu1  ;;  %v1349_v38 = vld [vmem:[%s2037_s4 + $0x2] sm:$0x3] }
 0x461   : > { %v841_v55 = vadd.f32 %v839_v52, %v833_v50  ;;  %v831_v56 = vpop.f32.mrb[15].mxu1  ;;  %v1354_v50 = vld [vmem:[%s2037_s4 + $0x4] sm:$0x3] }
 0x462   : > { %v842_v57 = vadd.f32 %v839_v52, %v834_v53 }
 0x463   : > { %v843_v58 = vmax.f32 %v841_v55, 0.0 }
 0x464   : > { %v844_v59 = vmax.f32 %v842_v57, 0.0 }
 0x465   : > { %v845_v61 = vpack.c.bf16 %v843_v58, %v843_v58 }
 0x466   : > { %v846_v60 = vpack.c.bf16 %v844_v59, %v844_v59 }
 0x467   : > { %v949_v39 = vsel %vm897_vm2, %v845_v61, 0 }
 0x468   : > { %880 = vmatprep.mubr.bf16.mxu1 %v846_v60 }
 0x469   : > { %881 = vmatmul.mubr.bf16.vlgmr.msra.gmra.mrb[16].mxu1 %v845_v61 }
 0x46a   : > { %996 = vmatpush1.bf16.msra.mxu1 %v1661_v1 }
 0x46b   : > { %997 = vmatprep.subr.bf16.mxu1 %v1665_v2 }
 0x46e   : > { %998 = vmatpush1.bf16.msra.mxu1 %v1669_v3 }
 0x46f   : > { %999 = vmatprep.subr.bf16.mxu1 %v1673_v4 }
 0x472   : > { %1000 = vmatpush1.bf16.msra.mxu1 %v1677_v5 }
 0x473   : > { %1001 = vmatprep.subr.bf16.mxu1 %v1682_v6 }
 0x476   : > { %1002 = vmatpush1.bf16.msra.mxu1 %v1686_v7 }
 0x477   : > { %1003 = vmatprep.subr.bf16.mxu1 %v1693_v8 }
 0x47a   : > { %1004 = vmatpush1.bf16.msra.mxu1 %v1697_v9 }
 0x47b   : > { %1005 = vmatprep.subr.bf16.mxu1 %v1702_v10 }
 0x47e   : > { %1006 = vmatpush1.bf16.msra.mxu1 %v1709_v11 }
 0x47f   : > { %1007 = vmatprep.subr.bf16.mxu1 %v1713_v12 }
 0x482   : > { %1008 = vmatpush1.bf16.msra.mxu1 %v1717_v15 }
 0x483   : > { %1009 = vmatprep.subr.bf16.mxu1 %v1721_v16 }
 0x486   : > { %1010 = vmatpush1.bf16.msra.mxu1 %v1725_v17 }
 0x487   : > { %1011 = vmatprep.subr.bf16.mxu1 %v1729_v18 }
 0x48a   : > { %1012 = vmatpush1.bf16.msra.mxu1 %v1733_v19 }
 0x48b   : > { %1013 = vmatprep.subr.bf16.mxu1 %v1737_v20 }
 0x48e   : > { %1014 = vmatpush1.bf16.msra.mxu1 %v1741_v21 }
 0x48f   : > { %1015 = vmatprep.subr.bf16.mxu1 %v1745_v22 }
 0x492   : > { %1016 = vmatpush1.bf16.msra.mxu1 %v1749_v23 }
 0x493   : > { %1017 = vmatprep.subr.bf16.mxu1 %v1753_v24 }
 0x496   : > { %1018 = vmatpush1.bf16.msra.mxu1 %v1757_v25 }
 0x497   : > { %1019 = vmatprep.subr.bf16.mxu1 %v1761_v26 }
 0x49a   : > { %1020 = vmatpush1.bf16.msra.mxu1 %v1765_v27 }
 0x49b   : > { %1021 = vmatprep.subr.bf16.mxu1 %v1769_v28 }
 0x49e   : > { %1022 = vmatpush1.bf16.msra.mxu1 %v1773_v29 }
 0x49f   : > { %1023 = vmatprep.subr.bf16.mxu1 %v1777_v30 }
 0x4a2   : > { %1024 = vmatpush1.bf16.msra.mxu1 %v1781_v31 }
 0x4a3   : > { %1025 = vmatprep.subr.bf16.mxu1 %v1785_v32 }
 0x4a6   : > { %1026 = vmatpush1.bf16.msra.mxu1 %v1789_v33 }
 0x53c   : > { %v882_v62 = vpop.f32.mrb[16].mxu1 }
 0x53d   : > { %v889_v63 = vpack.c.bf16 %v882_v62, %v882_v62  ;;  %v884_v13 = vpop.f32.mrb[17].mxu1 }
 0x53e   : > { %v890_v14 = vpack.c.bf16 %v884_v13, %v884_v13  ;;  %v886_v34 = vpop.f32.mrb[18].mxu1 }
 0x53f   : > { %v899_v36 = vsel %vm897_vm2, %v889_v63, 0  ;;  %v887_v37 = vpop.f32.mrb[19].mxu1 }
 0x540   : > { %1350 = vmatprep.subr.msk.bf16.mxu0 %vm897_vm2, %v890_v14  ;;  %1027 = vmatprep.mubr.bf16.mxu1 %v890_v14 }
 0x541   : > { %905 = vmatpush1.bf16.msra.mxu0 %v899_v36  ;;  %1028 = vmatmul.mubr.bf16.vlgmr.msra.gmra.mrb[20].mxu1 %v889_v63 }
 0x542   : > { %1352 = vmatprep.subr.msk.bf16.mxu0 %vm897_vm2, %v846_v60  ;;  %1178 = vmatprep.mubr.bf16.mxu1 %v1529_v35 }
 0x544   : > { %1351 = vmatmul.mubr.msk.bf16.vlgmr.msra.gmra.mrb[12].mxu0 %vm893_vm3, %v1349_v38 }
 0x545   : > { %955 = vmatpush1.bf16.msra.mxu0 %v949_v39  ;;  %986 = vmatprep.mubr.bf16.mxu0 %v1529_v35 }
 0x54c   : > { %1353 = vmatmul.mubr.msk.bf16.vlgmr.msra.gmra.mrb[16].mxu0 %vm893_vm3, %v847_v40 }
 0x54d   : > { %1081 = vmatprep.mubr.bf16.mxu0 %v1529_v35 }
 0x614   : > { %v1029_v41 = vpop.f32.mrb[20].mxu1 }
 0x615   : > { %v1036_v42 = vpack.c.bf16 %v1029_v41, %v1029_v41  ;;  %v1031_v43 = vpop.f32.mrb[21].mxu1 }
 0x616   : > { %v1037_v44 = vpack.c.bf16 %v1031_v43, %v1031_v43  ;;  %v1033_v45 = vpop.f32.mrb[22].mxu1 }
 0x617   : > { %v1044_v46 = vsel %vm897_vm2, %v1036_v42, 0  ;;  %v1034_v47 = vpop.f32.mrb[23].mxu1  ;;  %v938_v48 = vpop.f32.mrb[12].mxu0 }
 0x618   : > { %1355 = vmatprep.subr.msk.bf16.mxu0 %vm897_vm2, %v1037_v44  ;;  %v940_v49 = vpop.f32.mrb[13].mxu0 }
 0x619   : > { %1050 = vmatpush1.bf16.msra.mxu0 %v1044_v46  ;;  %v942_v51 = vpop.f32.mrb[14].mxu0 }
 0x61a   : > { %1092 = vmatprep.subr.bf16.mxu0 %v1658_v0  ;;  %v943_v35 = vpop.f32.mrb[15].mxu0 }
 0x61c   : > { %1356 = vmatmul.mubr.msk.bf16.vlgmr.msra.gmra.mrb[20].mxu0 %vm893_vm3, %v1354_v50 }
 0x61d   : > { %1093 = vmatpush1.bf16.msra.mxu0 %v1661_v1  ;;  %1124 = vmatprep.mubr.bf16.mxu0 %v1037_v44 }
 0x61e   : > { %1094 = vmatprep.subr.bf16.mxu0 %v1665_v2 }
 0x61f   : > { %v988_v52 = vpop.f32.mrb[16].mxu0 }
 0x620   : > { %v989_v53 = vadd.f32 %v988_v52, %v938_v48  ;;  %v990_v54 = vpop.f32.mrb[17].mxu0 }
 0x621   : > { %1095 = vmatpush1.bf16.msra.mxu0 %v1669_v3  ;;  %v991_v55 = vadd.f32 %v990_v54, %v940_v49  ;;  %v992_v56 = vpop.f32.mrb[18].mxu0 }
 0x622   : > { %1096 = vmatprep.subr.bf16.mxu0 %v1673_v4  ;;  %v993_v57 = vpop.f32.mrb[19].mxu0 }
 0x625   : > { %1097 = vmatpush1.bf16.msra.mxu0 %v1677_v5 }
 0x626   : > { %1098 = vmatprep.subr.bf16.mxu0 %v1682_v6 }
 0x629   : > { %1099 = vmatpush1.bf16.msra.mxu0 %v1686_v7 }
 0x62a   : > { %1100 = vmatprep.subr.bf16.mxu0 %v1693_v8 }
 0x62d   : > { %1101 = vmatpush1.bf16.msra.mxu0 %v1697_v9 }
 0x62e   : > { %1102 = vmatprep.subr.bf16.mxu0 %v1702_v10 }
 0x631   : > { %1103 = vmatpush1.bf16.msra.mxu0 %v1709_v11 }
 0x632   : > { %1104 = vmatprep.subr.bf16.mxu0 %v1713_v12 }
 0x635   : > { %1105 = vmatpush1.bf16.msra.mxu0 %v1717_v15  ;;  %v1357_v15 = vld [vmem:[%s2037_s4 + $0x6] sm:$0x3] }
 0x636   : > { %1106 = vmatprep.subr.bf16.mxu0 %v1721_v16 }
 0x639   : > { %1107 = vmatpush1.bf16.msra.mxu0 %v1725_v17 }
 0x63a   : > { %1108 = vmatprep.subr.bf16.mxu0 %v1729_v18 }
 0x63d   : > { %1109 = vmatpush1.bf16.msra.mxu0 %v1733_v19  ;;  %v1193_v19 = vpop.permute.xlu0 %1192 }
 0x63e   : > { %1110 = vmatprep.subr.bf16.mxu0 %v1737_v20 }
 0x641   : > { %1111 = vmatpush1.bf16.msra.mxu0 %v1741_v21 }
 0x642   : > { %1112 = vmatprep.subr.bf16.mxu0 %v1745_v22 }
 0x645   : > { %1113 = vmatpush1.bf16.msra.mxu0 %v1749_v23 }
 0x646   : > { %1114 = vmatprep.subr.bf16.mxu0 %v1753_v24 }
 0x649   : > { %1115 = vmatpush1.bf16.msra.mxu0 %v1757_v25 }
 0x64a   : > { %1116 = vmatprep.subr.bf16.mxu0 %v1761_v26 }
 0x64d   : > { %1117 = vmatpush1.bf16.msra.mxu0 %v1765_v27 }
 0x64e   : > { %1118 = vmatprep.subr.bf16.mxu0 %v1769_v28 }
 0x651   : > { %1119 = vmatpush1.bf16.msra.mxu0 %v1773_v29 }
 0x652   : > { %1120 = vmatprep.subr.bf16.mxu0 %v1777_v30 }
 0x655   : > { %1121 = vmatpush1.bf16.msra.mxu0 %v1781_v31 }
 0x656   : > { %1122 = vmatprep.subr.bf16.mxu0 %v1785_v32 }
 0x659   : > { %1123 = vmatpush1.bf16.msra.mxu0 %v1789_v33 }
 0x65c   : > { %1125 = vmatmul.mubr.bf16.vlgmr.msra.gmra.mrb[24].mxu0 %v1036_v42 }
 0x6ef   : > { %v1083_v0 = vpop.f32.mrb[20].mxu0 }
 0x6f0   : > { %v1090_v1 = vadd.f32 %v1083_v0, %v989_v53  ;;  %v1085_v2 = vpop.f32.mrb[21].mxu0 }
 0x6f1   : > { %v1091_v3 = vadd.f32 %v1085_v2, %v991_v55  ;;  %v1087_v4 = vpop.f32.mrb[22].mxu0 }
 0x6f2   : > { %v1088_v5 = vpop.f32.mrb[23].mxu0 }
 0x72f   : > { %v1126_v6 = vpop.f32.mrb[24].mxu0 }
 0x730   : > { %v1133_v7 = vpack.c.bf16 %v1126_v6, %v1126_v6  ;;  %v1128_v8 = vpop.f32.mrb[25].mxu0 }
 0x731   : > { %v1134_v9 = vpack.c.bf16 %v1128_v8, %v1128_v8  ;;  %v1130_v10 = vpop.f32.mrb[26].mxu0 }
 0x732   : > { %v1141_v11 = vsel %vm897_vm2, %v1133_v7, 0  ;;  %v1131_v12 = vpop.f32.mrb[27].mxu0 }
 0x733   : > { %1358 = vmatprep.subr.msk.bf16.mxu1 %vm897_vm2, %v1134_v9 }
 0x734   : > { %1147 = vmatpush1.bf16.msra.mxu1 %v1141_v11 }
 0x737   : > { %1359 = vmatmul.mubr.msk.bf16.vlgmr.msra.gmra.mrb[24].mxu1 %vm893_vm3, %v1357_v15 }
 0x80a   : > { %v1180_v16 = vpop.f32.mrb[24].mxu1 }
 0x80b   : > { %v1187_v17 = vadd.f32 %v1180_v16, %v1090_v1  ;;  %v1182_v18 = vpop.f32.mrb[25].mxu1 }
 0x80c   : > { %v1188_v20 = vadd.f32 %v1182_v18, %v1091_v3  ;;  %v1184_v21 = vpop.f32.mrb[26].mxu1 }
 0x80d   : > { %v1195_v22 = vadd.f32 %v1193_v19, %v1187_v17  ;;  %v1185_v23 = vpop.f32.mrb[27].mxu1 }
 0x80e   : > { %v1196_v24 = vadd.f32 %v1193_v19, %v1188_v20 }
 0x80f   : > { %v1197_v25 = vmax.f32 %v1195_v22, 0.0 }
 0x810   : > { %v1198_v26 = vmax.f32 %v1196_v24, 0.0 }
 0x812   : > { %v1360_v27 = vpack.c.bf16 %v1198_v26, %v1197_v25 }
 0x814   : > { %1361 = vst.sshfl [vmem:[%s291_s27] sm:$0x33 pattern:$0x76325410] %v1360_v27 }
 0x815 PF: > { %p16_p8 = scmp.ge.s32.totalorder %s1587_s26, 4   ;;  %s2043_s21 = smov %s1516_s22 }
 0x816   : > { %s2044_s22 = smov %s1520_s23  ;;  %s2045_s23 = smov %s1597_s29 }
 0x817   : > { %s2046_s24 = smov %s1587_s26  ;;  %18 = sbr.rel (!%p16_p8) target bundleno = 3 (0x3), region = 93 }
 0x81e   :  { %1234 = vsyncpa [#allocation3], 1 }
 0x81f   :  { %1236 = vsyncpa [#allocation3 + $0x1], 1 }

</bundles_post_ra>
